<compile_context>
chip_gen: v6e
topology: v6e:2x2x1
jax: 0.10.0
libtpu: 0.0.40
codegen_flags: <defaults>
</compile_context>

<pallas_src>
import functools

import jax
import jax.numpy as jnp
from jax.experimental import pallas as pl
from jax.experimental.pallas import tpu as pltpu

LANE = 128                # vreg lane width
SUBLANE = 8               # vreg sublane depth (f32)
DEFAULT_BLOCK_ROWS = 512  # batch tile: >=512 rows hits ~85% of HBM roofline


def _round_up(n, m):
    return ((n + m - 1) // m) * m


def _fused_mlp_kernel(x_ref, *refs, num_layers):
    """refs = (w0, b0, w1, b1, ..., w{L-1}, b{L-1}, out_ref).

    x_ref : (TB, fin_pad)   f32  batch tile (pipelined over the grid)
    wi    : (K_i, N_i)      f32  full block, constant index_map -> VMEM-resident
    bi    : (1,  N_i)       f32
    out   : (TB, fout_pad)  f32  lane-dense -> unmasked vst
    """
    o_ref = refs[2 * num_layers]
    h = x_ref[...]
    # Static unroll over the small fixed layer count (LLO sees all matmuls at once).
    for i in range(num_layers):
        w = refs[2 * i][...]
        b = refs[2 * i + 1][...]
        h = jnp.dot(h, w, preferred_element_type=jnp.float32) + b
        if i != num_layers - 1:
            h = jnp.maximum(h, 0.0)
    o_ref[...] = h.astype(o_ref.dtype)


def pad_params(params, input_size):
    """Zero-pad (W, b) ONCE (hoisted out of the hot path).

    First layer keeps its true contraction dim (rounded only to a sublane multiple);
    output/lane dims are padded to 128. Hidden-layer K dims are 128 because the hidden
    activations are lane-padded inside the kernel. Zero padding is exact.
    """
    padded = []
    last = _round_up(input_size, SUBLANE)
    for w, b in params:
        fi, fo = w.shape
        fo_pad = _round_up(fo, LANE)
        w_pad = (jnp.zeros((last, fo_pad), jnp.float32)
                 .at[:fi, :fo].set(w.astype(jnp.float32)))
        b_pad = (jnp.zeros((1, fo_pad), jnp.float32)
                 .at[:, :fo].set(b.reshape(1, fo).astype(jnp.float32)))
        padded.append((w_pad, b_pad))
        last = fo_pad
    return padded


@functools.partial(jax.jit, static_argnames=("out_features", "block_rows"))
def net_forward(padded_params, x, *, out_features, block_rows=DEFAULT_BLOCK_ROWS):
    """Equivalent of Net.forward: Sequential([Linear, ReLU]*layers, Linear)."""
    n, fin = x.shape
    num_layers = len(padded_params)
    fin_pad = padded_params[0][0].shape[0]
    fout_pad = padded_params[-1][0].shape[1]

    # Match weight / accumulation dtype explicitly.
    x = x.astype(jnp.float32)

    # Batch tiling: tile rows (multiple of 8); tiny batches collapse to grid=(1,).
    tb = min(block_rows, _round_up(n, SUBLANE))
    n_pad = _round_up(n, tb)
    grid = (n_pad // tb,)

    # Only the batch rows + the tiny fin dim get padded per call (cheap).
    x_pad = jnp.zeros((n_pad, fin_pad), jnp.float32).at[:n, :fin].set(x)

    inputs = [x_pad]
    in_specs = [pl.BlockSpec((tb, fin_pad), lambda i: (i, 0))]
    for w_pad, b_pad in padded_params:
        inputs += [w_pad, b_pad]
        # Constant index_map -> weights/biases DMA'd once, VMEM-resident across steps.
        in_specs += [
            pl.BlockSpec(w_pad.shape, lambda i: (0, 0)),
            pl.BlockSpec(b_pad.shape, lambda i: (0, 0)),
        ]
    out_specs = pl.BlockSpec((tb, fout_pad), lambda i: (i, 0))

    # Advisory cost estimate so XLA can overlap the custom call with surrounding ops.
    flops = 0
    bytes_accessed = x_pad.size * 4 + n_pad * fout_pad * 4
    for w_pad, b_pad in padded_params:
        flops += 2 * n_pad * w_pad.shape[0] * w_pad.shape[1]
        bytes_accessed += (w_pad.size + b_pad.size) * 4

    kernel = functools.partial(_fused_mlp_kernel, num_layers=num_layers)

    out_pad = pl.pallas_call(
        kernel,
        out_shape=jax.ShapeDtypeStruct((n_pad, fout_pad), jnp.float32),
        grid=grid,
        in_specs=in_specs,
        out_specs=out_specs,
        compiler_params=pltpu.CompilerParams(dimension_semantics=("parallel",)),
        cost_estimate=pl.CostEstimate(
            flops=flops, transcendentals=0, bytes_accessed=bytes_accessed),
    )(*inputs)

    return out_pad[:n, :out_features]


def init_mlp_params(key, input_size, neurons, output_size):
    """Deterministic init mimicking nn.Linear default (uniform +/- 1/sqrt(fan_in))."""
    params = []
    last_size = input_size
    sizes = list(neurons) + [output_size]
    for fan_out in sizes:
        key, kw, kb = jax.random.split(key, 3)
        bound = 1.0 / jnp.sqrt(jnp.float32(last_size))
        # PyTorch nn.Linear stores weight as (out, in); we store (in, out) = W^T
        # so the kernel computes x @ W, matching x @ weight.T in PyTorch.
        w = jax.random.uniform(kw, (last_size, fan_out), jnp.float32, -bound, bound)
        b = jax.random.uniform(kb, (fan_out,), jnp.float32, -bound, bound)
        params.append((w, b))
        last_size = fan_out
    return params


def _reference(params, x):
    ref = x
    for i, (w, b) in enumerate(params):
        ref = ref @ w + b
        if i != len(params) - 1:
            ref = jnp.maximum(ref, 0.0)
    return ref


if __name__ == "__main__":
    # Module-consistent small shapes: input_size=4, 2 hidden layers, output_size=3.
    input_size = 4
    output_size = 3
    layers = 2
    neurons = [32, 16]
    batch = 8

    key = jax.random.PRNGKey(0)
    key_x, key_p, key_x2 = jax.random.split(key, 3)
    x = jax.random.normal(key_x, (batch, input_size), jnp.float32)
    params = init_mlp_params(key_p, input_size, neurons, output_size)

    # Padding is hoisted out of the hot path: done once, reused across calls.
    padded = pad_params(params, input_size)

    out = jax.block_until_ready(net_forward(padded, x, out_features=output_size))
    assert out.shape == (batch, output_size), out.shape
    assert jnp.allclose(out, _reference(params, x), atol=1e-5, rtol=1e-5)

    # Exercise the pipelined multi-tile path (grid > 1, non-multiple batch).
    x_big = jax.random.normal(key_x2, (1040, input_size), jnp.float32)
    out_big = jax.block_until_ready(net_forward(padded, x_big, out_features=output_size))
    assert out_big.shape == (1040, output_size), out_big.shape
    assert jnp.allclose(out_big, _reference(params, x_big), atol=1e-5, rtol=1e-5)

    print("KERNEL_OK")
</pallas_src>

<mosaic_0001>
module attributes {stable_mosaic.version = 11 : i64} {
  func.func @_fused_mlp_kernel(%arg0: i32, %arg1: memref<8x8xf32, #tpu.memory_space<vmem>>, %arg2: memref<8x128xf32, #tpu.memory_space<vmem>>, %arg3: memref<1x128xf32, #tpu.memory_space<vmem>>, %arg4: memref<128x128xf32, #tpu.memory_space<vmem>>, %arg5: memref<1x128xf32, #tpu.memory_space<vmem>>, %arg6: memref<128x128xf32, #tpu.memory_space<vmem>>, %arg7: memref<1x128xf32, #tpu.memory_space<vmem>>, %arg8: memref<8x128xf32, #tpu.memory_space<vmem>>) attributes {dimension_semantics = [#tpu.dimension_semantics<parallel>], iteration_bounds = array<i64: 1>, scalar_prefetch = 0 : i64, scratch_operands = 0 : i64, tpu.core_type = #tpu.core_type<tc>, window_params = [{transform_indices = @transform_0, window_bounds = array<i64: 8, 8>}, {pipeline_mode = #tpu.pipeline_mode<synchronous>, transform_indices = @transform_1, window_bounds = array<i64: 8, 128>}, {pipeline_mode = #tpu.pipeline_mode<synchronous>, transform_indices = @transform_2, window_bounds = array<i64: 1, 128>}, {pipeline_mode = #tpu.pipeline_mode<synchronous>, transform_indices = @transform_3, window_bounds = array<i64: 128, 128>}, {pipeline_mode = #tpu.pipeline_mode<synchronous>, transform_indices = @transform_4, window_bounds = array<i64: 1, 128>}, {pipeline_mode = #tpu.pipeline_mode<synchronous>, transform_indices = @transform_5, window_bounds = array<i64: 128, 128>}, {pipeline_mode = #tpu.pipeline_mode<synchronous>, transform_indices = @transform_6, window_bounds = array<i64: 1, 128>}, {transform_indices = @transform_7, window_bounds = array<i64: 8, 128>}]} {
    %c0 = arith.constant 0 : index
    %c0_0 = arith.constant 0 : index
    %0 = vector.load %arg1[%c0, %c0_0] : memref<8x8xf32, #tpu.memory_space<vmem>>, vector<8x8xf32>
    %c0_1 = arith.constant 0 : index
    %c0_2 = arith.constant 0 : index
    %1 = vector.load %arg2[%c0_1, %c0_2] : memref<8x128xf32, #tpu.memory_space<vmem>>, vector<8x128xf32>
    %c0_3 = arith.constant 0 : index
    %c0_4 = arith.constant 0 : index
    %2 = vector.load %arg3[%c0_3, %c0_4] : memref<1x128xf32, #tpu.memory_space<vmem>>, vector<1x128xf32>
    %cst = arith.constant dense<0.000000e+00> : vector<8x128xf32>
    %3 = tpu.matmul %0, %1, %cst {dimension_numbers = #tpu.dot_dimension_numbers<[1], [0], [0], [1], [0, 0, 1, 1], [], []>} : vector<8x8xf32>, vector<8x128xf32>, vector<8x128xf32> -> vector<8x128xf32>
    %4 = vector.broadcast %2 : vector<1x128xf32> to vector<8x128xf32>
    %5 = arith.addf %3, %4 : vector<8x128xf32>
    %cst_5 = arith.constant 0.000000e+00 : f32
    %6 = vector.broadcast %cst_5 : f32 to vector<8x128xf32>
    %7 = arith.maximumf %5, %6 : vector<8x128xf32>
    %c0_6 = arith.constant 0 : index
    %c0_7 = arith.constant 0 : index
    %8 = vector.load %arg4[%c0_6, %c0_7] : memref<128x128xf32, #tpu.memory_space<vmem>>, vector<128x128xf32>
    %c0_8 = arith.constant 0 : index
    %c0_9 = arith.constant 0 : index
    %9 = vector.load %arg5[%c0_8, %c0_9] : memref<1x128xf32, #tpu.memory_space<vmem>>, vector<1x128xf32>
    %cst_10 = arith.constant dense<0.000000e+00> : vector<8x128xf32>
    %10 = tpu.matmul %7, %8, %cst_10 {dimension_numbers = #tpu.dot_dimension_numbers<[1], [0], [0], [1], [0, 0, 1, 1], [], []>} : vector<8x128xf32>, vector<128x128xf32>, vector<8x128xf32> -> vector<8x128xf32>
    %11 = vector.broadcast %9 : vector<1x128xf32> to vector<8x128xf32>
    %12 = arith.addf %10, %11 : vector<8x128xf32>
    %cst_11 = arith.constant 0.000000e+00 : f32
    %13 = vector.broadcast %cst_11 : f32 to vector<8x128xf32>
    %14 = arith.maximumf %12, %13 : vector<8x128xf32>
    %c0_12 = arith.constant 0 : index
    %c0_13 = arith.constant 0 : index
    %15 = vector.load %arg6[%c0_12, %c0_13] : memref<128x128xf32, #tpu.memory_space<vmem>>, vector<128x128xf32>
    %c0_14 = arith.constant 0 : index
    %c0_15 = arith.constant 0 : index
    %16 = vector.load %arg7[%c0_14, %c0_15] : memref<1x128xf32, #tpu.memory_space<vmem>>, vector<1x128xf32>
    %cst_16 = arith.constant dense<0.000000e+00> : vector<8x128xf32>
    %17 = tpu.matmul %14, %15, %cst_16 {dimension_numbers = #tpu.dot_dimension_numbers<[1], [0], [0], [1], [0, 0, 1, 1], [], []>} : vector<8x128xf32>, vector<128x128xf32>, vector<8x128xf32> -> vector<8x128xf32>
    %18 = vector.broadcast %16 : vector<1x128xf32> to vector<8x128xf32>
    %19 = arith.addf %17, %18 : vector<8x128xf32>
    %c0_17 = arith.constant 0 : index
    %c0_18 = arith.constant 0 : index
    %20 = vector.load %arg8[%c0_17, %c0_18] : memref<8x128xf32, #tpu.memory_space<vmem>>, vector<8x128xf32>
    tpu.vector_store %arg8[%c0_17, %c0_18], %19 {strides = array<i32>} : memref<8x128xf32, #tpu.memory_space<vmem>>, vector<8x128xf32>,
    return
  }
  func.func @transform_0(%arg0: i32) -> (i32, i32) {
    %c0_i32 = arith.constant 0 : i32
    %c0_i32_0 = arith.constant 0 : i32
    return %arg0, %c0_i32 : i32, i32
  }
  func.func @transform_1(%arg0: i32) -> (i32, i32) {
    %c0_i32 = arith.constant 0 : i32
    %c0_i32_0 = arith.constant 0 : i32
    %c0_i32_1 = arith.constant 0 : i32
    return %c0_i32, %c0_i32_0 : i32, i32
  }
  func.func @transform_2(%arg0: i32) -> (i32, i32) {
    %c0_i32 = arith.constant 0 : i32
    %c0_i32_0 = arith.constant 0 : i32
    %c0_i32_1 = arith.constant 0 : i32
    return %c0_i32, %c0_i32_0 : i32, i32
  }
  func.func @transform_3(%arg0: i32) -> (i32, i32) {
    %c0_i32 = arith.constant 0 : i32
    %c0_i32_0 = arith.constant 0 : i32
    %c0_i32_1 = arith.constant 0 : i32
    return %c0_i32, %c0_i32_0 : i32, i32
  }
  func.func @transform_4(%arg0: i32) -> (i32, i32) {
    %c0_i32 = arith.constant 0 : i32
    %c0_i32_0 = arith.constant 0 : i32
    %c0_i32_1 = arith.constant 0 : i32
    return %c0_i32, %c0_i32_0 : i32, i32
  }
  func.func @transform_5(%arg0: i32) -> (i32, i32) {
    %c0_i32 = arith.constant 0 : i32
    %c0_i32_0 = arith.constant 0 : i32
    %c0_i32_1 = arith.constant 0 : i32
    return %c0_i32, %c0_i32_0 : i32, i32
  }
  func.func @transform_6(%arg0: i32) -> (i32, i32) {
    %c0_i32 = arith.constant 0 : i32
    %c0_i32_0 = arith.constant 0 : i32
    %c0_i32_1 = arith.constant 0 : i32
    return %c0_i32, %c0_i32_0 : i32, i32
  }
  func.func @transform_7(%arg0: i32) -> (i32, i32) {
    %c0_i32 = arith.constant 0 : i32
    %c0_i32_0 = arith.constant 0 : i32
    return %arg0, %c0_i32 : i32, i32
  }
}

</mosaic_0001>

<bundles_post_ra>
// kernel: net_forward.1
= control target key start
LH: loop header
LB: loop body
LE: loop exit
PB: predicated region body
PF: predicated region fallthrough
CT: control target
= control target key end

     0   :  { %12 = vsyncpa [#allocation3], 0  ;;  %s606_s0 = inlined_call_operand.vmem [shape: f32[8,8], index: 0, kind: input, shape index: {}]   ;;  %s607_s1 = inlined_call_operand.vmem [shape: f32[8,128], index: 1, kind: input, shape index: {}]   ;;  %s608_s2 = inlined_call_operand.vmem [shape: f32[1,128], index: 2, kind: input, shape index: {}]   ;;  %s609_s3 = inlined_call_operand.hbm [shape: f32[128,128], index: 3, kind: input, shape index: {}]   ;;  %s610_s4 = inlined_call_operand.vmem [shape: f32[1,128], index: 4, kind: input, shape index: {}]   ;;  %s611_s5 = inlined_call_operand.hbm [shape: f32[128,128], index: 5, kind: input, shape index: {}]   ;;  %s612_s6 = inlined_call_operand.vmem [shape: f32[1,128], index: 6, kind: input, shape index: {}]   ;;  %s613_s7 = inlined_call_operand.vmem [shape: f32[8,128], index: 7, kind: output, shape index: {}]  }
   0x1   :  { %13 = vsyncpa [#allocation5], 0  ;;  %s497_s24 = smov [#allocation2]  }
   0x2   :  { %s25_s25 = sshll.u32 %s497_s24, 4  ;;  %s26_s25 = int_to_ptr.vmem [resolvable:$true] %s25_s25 }
   0x3   :  { %s461_s26 = scalar_lea.vmem %s26_s25, 2048  ;;  %p466_p1 = scmp.lt.s32.totalorder %s26_s25, %s26_s25 }
   0x4   :  { %p462_p0 = scmp.ne.s32.totalorder %s26_s25, %s461_s26  ;;  %p467_p2 = scmp.lt.s32.totalorder %s461_s26, %s461_s26 }
   0x6   :  { %p468_p3 = por %p467_p2, %p466_p1 }
   0x8   :  { %p469_p4 = pnand %p468_p3, %p462_p0 }
   0xa   :  { %472 = shalt.err (!%p469_p4)
}
   0xb   :  { %s498_s27 = smov 128   ;;  %s499_s28 = smov 8  }
   0xc   :  { %31 = dma.hbm_to_vmem [thread:$0]  %s609_s3, 2048, %s26_s25, [#allocation3], %s498_s27, %s498_s27, %s499_s28  }
   0xd   :  { %s500_s8 = smov [#allocation4]  }
   0xe   :  { %s39_s9 = sshll.u32 %s500_s8, 4  ;;  %s40_s9 = int_to_ptr.vmem [resolvable:$true] %s39_s9 }
   0xf   :  { %s481_s10 = scalar_lea.vmem %s40_s9, 2048  ;;  %p486_p6 = scmp.lt.s32.totalorder %s40_s9, %s40_s9 }
  0x10   :  { %p482_p5 = scmp.ne.s32.totalorder %s40_s9, %s481_s10  ;;  %p487_p7 = scmp.lt.s32.totalorder %s481_s10, %s481_s10 }
  0x12   :  { %p488_p8 = por %p487_p7, %p486_p6 }
  0x14   :  { %p489_p9 = pnand %p488_p8, %p482_p5 }
  0x16   :  { %492 = shalt.err (!%p489_p9)
}
  0x17   :  { %45 = dma.hbm_to_vmem [thread:$0]  %s611_s5, 2048, %s40_s9, [#allocation5], %s498_s27, %s498_s27, %s499_s28  }
  0x18   :  { %493 = dma.done.wait [#allocation3], 2048  }
  0x19   :  { %494 = vsyncadd [#allocation3], 4294965248 }
  0x1a   :  { %495 = dma.done.wait [#allocation5], 2048  }
  0x1b   :  { %496 = vsyncadd [#allocation5], 4294965248  ;;  %v501_v0 = vmov 0.0   ;;  %vm502_vm0 = vmmov 0   ;;  %vm63_vm1 = vcmask 64512   ;;  %v55_v1 = vld [vmem:[%s607_s1] sm:$0xff] }
  0x1c   :  { %372 = vmatprep.subr.mxu0 %v501_v0  ;;  %374 = vmatprep.mubr.msk.f32.mxu0 %vm502_vm0, %v501_v0  ;;  %v54_v2 = vld [vmem:[%s606_s0] sm:$0xff]  ;;  %v153_v3 = vld [vmem:[#allocation2 + $0x78] sm:$0xff]  ;;  %v152_v4 = vld [vmem:[#allocation2 + $0x70] sm:$0xff] }
  0x1d   :  { %377 = vmatprep.subr.mxu1 %v501_v0  ;;  %409 = vmatprep.mubr.msk.f32.mxu1 %vm502_vm0, %v501_v0  ;;  %v151_v5 = vld [vmem:[#allocation2 + $0x68] sm:$0xff]  ;;  %v150_v6 = vld [vmem:[#allocation2 + $0x60] sm:$0xff]  ;;  %v149_v7 = vld [vmem:[#allocation2 + $0x58] sm:$0xff] }
  0x1e   :  { %373 = vmatpush3.msra.mxu0 %v55_v1  ;;  %378 = vmatpush3.msra.mxu1 %v153_v3  ;;  %v148_v8 = vld [vmem:[#allocation2 + $0x50] sm:$0xff]  ;;  %v147_v9 = vld [vmem:[#allocation2 + $0x48] sm:$0xff]  ;;  %v146_v10 = vld [vmem:[#allocation2 + $0x40] sm:$0xff] }
  0x1f   :  { %375 = vmatmul.mubr.msk.f32.vlgmr.msra.gmra.mxu0 %vm63_vm1, %v54_v2  ;;  %379 = vmatprep.subr.mxu1 %v501_v0  ;;  %v145_v11 = vld [vmem:[#allocation2 + $0x38] sm:$0xff]  ;;  %v144_v12 = vld [vmem:[#allocation2 + $0x30] sm:$0xff]  ;;  %v143_v13 = vld [vmem:[#allocation2 + $0x28] sm:$0xff] }
  0x20   :  { %380 = vmatpush3.msra.mxu1 %v152_v4  ;;  %412 = vmatprep.subr.mxu0 %v501_v0  ;;  %v142_v14 = vld [vmem:[#allocation2 + $0x20] sm:$0xff]  ;;  %v141_v15 = vld [vmem:[#allocation2 + $0x18] sm:$0xff]  ;;  %v140_v16 = vld [vmem:[#allocation2 + $0x10] sm:$0xff] }
  0x21   :  { %381 = vmatprep.subr.mxu1 %v501_v0  ;;  %444 = vmatprep.mubr.msk.f32.mxu0 %vm502_vm0, %v501_v0  ;;  %v139_v17 = vld [vmem:[#allocation2 + $0x8] sm:$0xff]  ;;  %v138_v18 = vld [vmem:[#allocation2] sm:$0xff]  ;;  %v247_v19 = vld [vmem:[#allocation4 + $0x78] sm:$0xff] }
  0x22   :  { %382 = vmatpush3.msra.mxu1 %v151_v5  ;;  %v246_v20 = vld [vmem:[#allocation4 + $0x70] sm:$0xff]  ;;  %413 = vmatpush3.msra.mxu0 %v247_v19  ;;  %v245_v21 = vld [vmem:[#allocation4 + $0x68] sm:$0xff]  ;;  %v244_v22 = vld [vmem:[#allocation4 + $0x60] sm:$0xff] }
  0x23   :  { %383 = vmatprep.subr.mxu1 %v501_v0  ;;  %414 = vmatprep.subr.mxu0 %v501_v0  ;;  %v243_v23 = vld [vmem:[#allocation4 + $0x58] sm:$0xff]  ;;  %v242_v24 = vld [vmem:[#allocation4 + $0x50] sm:$0xff]  ;;  %v241_v25 = vld [vmem:[#allocation4 + $0x48] sm:$0xff] }
  0x24   :  { %384 = vmatpush3.msra.mxu1 %v150_v6  ;;  %415 = vmatpush3.msra.mxu0 %v246_v20  ;;  %v240_v26 = vld [vmem:[#allocation4 + $0x40] sm:$0xff]  ;;  %v239_v27 = vld [vmem:[#allocation4 + $0x38] sm:$0xff]  ;;  %v238_v28 = vld [vmem:[#allocation4 + $0x30] sm:$0xff] }
  0x25   :  { %385 = vmatprep.subr.mxu1 %v501_v0  ;;  %416 = vmatprep.subr.mxu0 %v501_v0  ;;  %v237_v29 = vld [vmem:[#allocation4 + $0x28] sm:$0xff]  ;;  %v236_v30 = vld [vmem:[#allocation4 + $0x20] sm:$0xff]  ;;  %v235_v31 = vld [vmem:[#allocation4 + $0x18] sm:$0xff] }
  0x26   :  { %386 = vmatpush3.msra.mxu1 %v149_v7  ;;  %417 = vmatpush3.msra.mxu0 %v245_v21  ;;  %v332_v32 = vld [vmem:[%s608_s2] ss:$0 sm:$0xff]  ;;  %v234_v37 = vld [vmem:[#allocation4 + $0x10] sm:$0xff]  ;;  %v233_v38 = vld [vmem:[#allocation4 + $0x8] sm:$0xff] }
  0x27   :  { %387 = vmatprep.subr.mxu1 %v501_v0  ;;  %418 = vmatprep.subr.mxu0 %v501_v0  ;;  %v232_v39 = vld [vmem:[#allocation4] sm:$0xff] }
  0x28   :  { %388 = vmatpush3.msra.mxu1 %v148_v8  ;;  %419 = vmatpush3.msra.mxu0 %v244_v22  ;;  %v334_v40 = vld [vmem:[%s610_s4] ss:$0 sm:$0xff] }
  0x29   :  { %389 = vmatprep.subr.mxu1 %v501_v0  ;;  %420 = vmatprep.subr.mxu0 %v501_v0  ;;  %v335_v45 = vld [vmem:[%s612_s6] ss:$0 sm:$0xff] }
  0x2a   :  { %390 = vmatpush3.msra.mxu1 %v147_v9  ;;  %421 = vmatpush3.msra.mxu0 %v243_v23 }
  0x2b   :  { %391 = vmatprep.subr.mxu1 %v501_v0  ;;  %422 = vmatprep.subr.mxu0 %v501_v0 }
  0x2c   :  { %392 = vmatpush3.msra.mxu1 %v146_v10  ;;  %423 = vmatpush3.msra.mxu0 %v242_v24 }
  0x2d   :  { %393 = vmatprep.subr.mxu1 %v501_v0  ;;  %424 = vmatprep.subr.mxu0 %v501_v0 }
  0x2e   :  { %394 = vmatpush3.msra.mxu1 %v145_v11  ;;  %425 = vmatpush3.msra.mxu0 %v241_v25 }
  0x2f   :  { %395 = vmatprep.subr.mxu1 %v501_v0  ;;  %426 = vmatprep.subr.mxu0 %v501_v0 }
  0x30   :  { %396 = vmatpush3.msra.mxu1 %v144_v12  ;;  %427 = vmatpush3.msra.mxu0 %v240_v26 }
  0x31   :  { %397 = vmatprep.subr.mxu1 %v501_v0  ;;  %428 = vmatprep.subr.mxu0 %v501_v0 }
  0x32   :  { %398 = vmatpush3.msra.mxu1 %v143_v13  ;;  %429 = vmatpush3.msra.mxu0 %v239_v27 }
  0x33   :  { %399 = vmatprep.subr.mxu1 %v501_v0  ;;  %430 = vmatprep.subr.mxu0 %v501_v0 }
  0x34   :  { %400 = vmatpush3.msra.mxu1 %v142_v14  ;;  %431 = vmatpush3.msra.mxu0 %v238_v28 }
  0x35   :  { %401 = vmatprep.subr.mxu1 %v501_v0  ;;  %432 = vmatprep.subr.mxu0 %v501_v0 }
  0x36   :  { %402 = vmatpush3.msra.mxu1 %v141_v15  ;;  %433 = vmatpush3.msra.mxu0 %v237_v29 }
  0x37   :  { %403 = vmatprep.subr.mxu1 %v501_v0  ;;  %434 = vmatprep.subr.mxu0 %v501_v0 }
  0x38   :  { %404 = vmatpush3.msra.mxu1 %v140_v16  ;;  %435 = vmatpush3.msra.mxu0 %v236_v30 }
  0x39   :  { %405 = vmatprep.subr.mxu1 %v501_v0  ;;  %436 = vmatprep.subr.mxu0 %v501_v0 }
  0x3a   :  { %406 = vmatpush3.msra.mxu1 %v139_v17  ;;  %437 = vmatpush3.msra.mxu0 %v235_v31 }
  0x3b   :  { %407 = vmatprep.subr.mxu1 %v501_v0  ;;  %438 = vmatprep.subr.mxu0 %v501_v0 }
  0x3c   :  { %408 = vmatpush3.msra.mxu1 %v138_v18  ;;  %439 = vmatpush3.msra.mxu0 %v234_v37 }
  0x3d   :  { %440 = vmatprep.subr.mxu0 %v501_v0 }
  0x3e   :  { %441 = vmatpush3.msra.mxu0 %v233_v38 }
  0x3f   :  { %442 = vmatprep.subr.mxu0 %v501_v0 }
  0x40   :  { %443 = vmatpush3.msra.mxu0 %v232_v39 }
  0xdf   :  { %v133_v33 = vpop.f32.mrf.mxu0 }
  0xe0   :  { %v134_v34 = vadd.f32 %v332_v32, %v133_v33 }
  0xe1   :  { %v376_v35 = vpop.f32.mrf.mxu0 }
  0xe2   :  { %v137_v36 = vmax.f32 %v134_v34, 0.0 }
  0xe4   :  { %410 = vmatmul.mubr.f32.vlgmr.msra.gmra.mxu1 %v137_v36 }
 0x1a4   :  { %v227_v41 = vpop.f32.mrf.mxu1 }
 0x1a5   :  { %v228_v42 = vadd.f32 %v334_v40, %v227_v41 }
 0x1a6   :  { %v411_v43 = vpop.f32.mrf.mxu1 }
 0x1a7   :  { %v231_v44 = vmax.f32 %v228_v42, 0.0 }
 0x1a9   :  { %445 = vmatmul.mubr.f32.vlgmr.msra.gmra.mxu0 %v231_v44 }
 0x269   :  { %v321_v46 = vpop.f32.mrf.mxu0 }
 0x26a   :  { %v322_v47 = vadd.f32 %v335_v45, %v321_v46 }
 0x26b   :  { %v446_v48 = vpop.f32.mrf.mxu0 }
 0x26c   :  { %325 = vst [vmem:[%s613_s7] sm:$0xff] %v322_v47 }
 0x26d   :  { %330 = vsyncpa [#allocation3], 1 }
 0x26e   :  { %331 = vsyncpa [#allocation5], 1 }

</bundles_post_ra>
